<compile_context>
chip_gen: v5e
topology: v5e:2x2
jax: 0.10.0
libtpu: 0.0.40
codegen_flags: <defaults>
</compile_context>

<pallas_src>
import functools

import jax
import jax.numpy as jnp
from jax import lax
from jax.experimental import pallas as pl
from jax.experimental.pallas import tpu as pltpu

TILE_M = 512            # patch rows per grid step
TILE_N = 128            # output-channel tile (lane-dense stores)
MAX_TILE_K = 512        # K-reduction tile, used only for large K
K_TILING_THRESHOLD = 2048


def _round_up(x, m):
    return ((x + m - 1) // m) * m


# ---------------------------------------------------------------------------
# Pallas kernel: acc += patches_tile @ W_tile over K tiles;
# epilogue (k == last): + bias, LeakyReLU(neg_slope), store.
# ---------------------------------------------------------------------------
def _conv_mm_act_kernel(p_ref, w_ref, b_ref, o_ref, acc_ref, *, neg_slope):
    k = pl.program_id(2)

    @pl.when(k == 0)
    def _init():
        acc_ref[...] = jnp.zeros_like(acc_ref)

    acc_ref[...] += jnp.dot(p_ref[...], w_ref[...],
                            preferred_element_type=jnp.float32)

    @pl.when(k == pl.num_programs(2) - 1)
    def _finalize():
        acc = acc_ref[...] + b_ref[...]              # (1, TILE_N) broadcasts
        o_ref[...] = jnp.maximum(acc, neg_slope * acc).astype(o_ref.dtype)


def _conv_matmul_leakyrelu(patches, w_mat, bias_row, neg_slope,
                           out_dtype=jnp.float32):
    M, K = patches.shape
    Kw, cout_pad = w_mat.shape
    assert K == Kw
    assert cout_pad % TILE_N == 0

    tile_m = min(TILE_M, _round_up(M, 8))
    tile_n = TILE_N
    if K > K_TILING_THRESHOLD:
        assert K % MAX_TILE_K == 0, "caller must pad K to a multiple of MAX_TILE_K"
        tile_k = MAX_TILE_K
    else:
        tile_k = K                                  # single full-K tile

    n_m = pl.cdiv(M, tile_m)
    n_n = cout_pad // tile_n
    n_k = K // tile_k

    kernel = functools.partial(_conv_mm_act_kernel, neg_slope=neg_slope)

    cost = pl.CostEstimate(
        flops=2 * M * K * cout_pad,
        transcendentals=0,
        bytes_accessed=int(patches.size * patches.dtype.itemsize
                           + n_m * w_mat.size * w_mat.dtype.itemsize
                           + M * cout_pad * jnp.dtype(out_dtype).itemsize),
    )

    return pl.pallas_call(
        kernel,
        out_shape=jax.ShapeDtypeStruct((M, cout_pad), out_dtype),
        grid_spec=pltpu.PrefetchScalarGridSpec(
            num_scalar_prefetch=0,
            grid=(n_m, n_n, n_k),
            in_specs=[
                # patch tile: varies with M and K grid axes only
                pl.BlockSpec((tile_m, tile_k), lambda i, j, k: (i, k)),
                # weight tile: varies with K / Cout axes only (stays resident /
                # no redundant DMA while its block index is unchanged)
                pl.BlockSpec((tile_k, tile_n), lambda i, j, k: (k, j)),
                # bias tile: varies with Cout axis only
                pl.BlockSpec((1, tile_n), lambda i, j, k: (0, j)),
            ],
            out_specs=pl.BlockSpec((tile_m, tile_n), lambda i, j, k: (i, j)),
            scratch_shapes=[pltpu.VMEM((tile_m, tile_n), jnp.float32)],
        ),
        compiler_params=pltpu.CompilerParams(
            dimension_semantics=("parallel", "parallel", "arbitrary"),
            vmem_limit_bytes=32 * 1024 * 1024,
        ),
        cost_estimate=cost,
    )(patches, w_mat, bias_row)


# ---------------------------------------------------------------------------
# Glue: im2col, spectral norm (parameter setup), layout conversion
# ---------------------------------------------------------------------------
def _im2col(x_nhwc, kh, kw, stride, padding):
    N, H, W, C = x_nhwc.shape
    xp = jnp.pad(x_nhwc, ((0, 0), (padding, padding), (padding, padding), (0, 0)))
    OH = (H + 2 * padding - kh) // stride + 1
    OW = (W + 2 * padding - kw) // stride + 1
    cols = []
    for ky in range(kh):
        for kx in range(kw):
            patch = lax.slice(
                xp,
                (0, ky, kx, 0),
                (N, ky + (OH - 1) * stride + 1, kx + (OW - 1) * stride + 1, C),
                (1, stride, stride, 1),
            )  # (N, OH, OW, C)
            cols.append(patch)
    patches = jnp.concatenate(cols, axis=-1)        # order (ky, kx, c)
    return patches.reshape(N * OH * OW, kh * kw * C), OH, OW


def spectral_norm_weight(weight_oihw, u, eps=1e-12):
    """One power-iteration step (PyTorch spectral_norm semantics, training mode)."""
    cout = weight_oihw.shape[0]
    w_mat = weight_oihw.reshape(cout, -1)           # (Cout, Cin*KH*KW)
    v = w_mat.T @ u
    v = v / (jnp.linalg.norm(v) + eps)
    u_new = w_mat @ v
    u_new = u_new / (jnp.linalg.norm(u_new) + eps)
    sigma = u_new @ (w_mat @ v)
    return weight_oihw / sigma


@functools.partial(jax.jit,
                   static_argnames=("stride", "padding", "neg_slope"))
def sn_conv2_with_activation(x_nchw, weight_sn_oihw, bias, stride, padding,
                             neg_slope=0.2):
    N, Cin, H, W = x_nchw.shape
    Cout, _, KH, KW = weight_sn_oihw.shape
    K = KH * KW * Cin

    # NCHW -> NHWC + bf16 cast before im2col so the KH*KW-amplified patch
    # matrix is materialized at half the bytes.
    # TODO(synk): keep the surrounding model NHWC end-to-end to drop these
    # transposes (kept here to match the PyTorch module's NCHW convention).
    x_nhwc = jnp.transpose(x_nchw, (0, 2, 3, 1)).astype(jnp.bfloat16)
    patches, OH, OW = _im2col(x_nhwc, KH, KW, stride, padding)   # (M, K) bf16

    # weight as (K, Cout) with row ordering (ky, kx, cin) matching the patches
    w_mat = jnp.transpose(weight_sn_oihw, (2, 3, 1, 0)).reshape(K, Cout)
    w_mat = w_mat.astype(jnp.bfloat16)

    # lane-dense output: pad Cout up to a multiple of 128, slice after the call
    cout_pad = _round_up(Cout, TILE_N)
    if cout_pad != Cout:
        w_mat = jnp.pad(w_mat, ((0, 0), (0, cout_pad - Cout)))
    bias_row = jnp.zeros((1, cout_pad), jnp.float32).at[0, :Cout].set(
        bias.astype(jnp.float32))

    # K tiling only kicks in for large layers; pad K with zeros then.
    if K > K_TILING_THRESHOLD:
        k_pad = _round_up(K, MAX_TILE_K)
        patches = jnp.pad(patches, ((0, 0), (0, k_pad - K)))
        w_mat = jnp.pad(w_mat, ((0, k_pad - K), (0, 0)))

    out_flat = _conv_matmul_leakyrelu(patches, w_mat, bias_row, neg_slope)
    out_flat = out_flat[:, :Cout]                   # drop Cout padding
    out_nhwc = out_flat.reshape(N, OH, OW, Cout)
    return jnp.transpose(out_nhwc, (0, 3, 1, 2))    # back to NCHW like PyTorch


# ---------------------------------------------------------------------------
# Demo / correctness check
# ---------------------------------------------------------------------------
def _run_case(key, *, N, Cin, H, W, Cout, ksz, stride, padding):
    k1, k2, k3, k4 = jax.random.split(key, 4)
    x = jax.random.normal(k1, (N, Cin, H, W), jnp.float32)

    # deterministic "kaiming normal"-style init (shapes from Conv2d(Cin, Cout, K))
    fan_in = Cin * ksz * ksz
    weight = jax.random.normal(k2, (Cout, Cin, ksz, ksz), jnp.float32) * jnp.sqrt(2.0 / fan_in)
    bias = jax.random.normal(k3, (Cout,), jnp.float32) * 0.1

    # spectral-norm left singular vector estimate u (as PyTorch stores it)
    u = jax.random.normal(k4, (Cout,), jnp.float32)
    u = u / (jnp.linalg.norm(u) + 1e-12)
    w_sn = spectral_norm_weight(weight, u)

    out = sn_conv2_with_activation(x, w_sn, bias, stride, padding)
    out = jax.block_until_ready(out)

    # pure-JAX reference built from the SAME bf16-quantized operands
    # (accumulation is f32 in both paths, so the comparison stays tight).
    x_q = x.astype(jnp.bfloat16).astype(jnp.float32)
    w_q = w_sn.astype(jnp.bfloat16).astype(jnp.float32)
    ref = lax.conv_general_dilated(
        x_q, w_q, window_strides=(stride, stride),
        padding=((padding, padding), (padding, padding)),
        dimension_numbers=("NCHW", "OIHW", "NCHW"),
        precision=lax.Precision.HIGHEST)
    ref = ref + bias[None, :, None, None]
    ref = jnp.where(ref >= 0, ref, 0.2 * ref)

    assert out.shape == ref.shape
    err = float(jnp.max(jnp.abs(out - ref)))
    assert jnp.allclose(out, ref, atol=1e-4, rtol=1e-4), f"max abs err {err}"


if __name__ == "__main__":
    # shapes implied by the module defaults (small discriminator-style conv)
    _run_case(jax.random.PRNGKey(0), N=2, Cin=4, H=16, W=16, Cout=8,
              ksz=3, stride=1, padding=1)
    # second small case: stride=2, Cout=160 (-> two 128-lane output tiles),
    # and an M that is not a multiple of the tile (exercises tail masking)
    _run_case(jax.random.PRNGKey(1), N=2, Cin=8, H=20, W=20, Cout=160,
              ksz=3, stride=2, padding=1)
    print("KERNEL_OK")
</pallas_src>

<mosaic_0001>
module attributes {stable_mosaic.version = 11 : i64} {
  func.func @_conv_mm_act_kernel(%arg0: i32, %arg1: i32, %arg2: i32, %arg3: memref<512x36xbf16, #tpu.memory_space<vmem>>, %arg4: memref<36x128xbf16, #tpu.memory_space<vmem>>, %arg5: memref<1x128xf32, #tpu.memory_space<vmem>>, %arg6: memref<512x128xf32, #tpu.memory_space<vmem>>, %arg7: memref<512x128xf32, #tpu.memory_space<vmem>>) attributes {dimension_semantics = [#tpu.dimension_semantics<parallel>, #tpu.dimension_semantics<parallel>, #tpu.dimension_semantics<arbitrary>], iteration_bounds = array<i64: 1, 1, 1>, scalar_prefetch = 0 : i64, scratch_operands = 1 : i64, tpu.core_type = #tpu.core_type<tc>, window_params = [{transform_indices = @transform_0, window_bounds = array<i64: 512, 36>}, {transform_indices = @transform_1, window_bounds = array<i64: 36, 128>}, {transform_indices = @transform_2, window_bounds = array<i64: 1, 128>}, {transform_indices = @transform_3, window_bounds = array<i64: 512, 128>}]} {
    %c0_i32 = arith.constant 0 : i32
    %0 = arith.cmpi eq, %arg2, %c0_i32 : i32
    %1 = arith.extui %0 : i1 to i32
    %c0_i32_0 = arith.constant 0 : i32
    %2 = arith.cmpi ne, %1, %c0_i32_0 : i32
    scf.if %2 {
      %cst_10 = arith.constant 0.000000e+00 : f32
      %12 = vector.broadcast %cst_10 : f32 to vector<512x128xf32>
      %c0_11 = arith.constant 0 : index
      %c0_12 = arith.constant 0 : index
      %13 = vector.load %arg7[%c0_11, %c0_12] : memref<512x128xf32, #tpu.memory_space<vmem>>, vector<512x128xf32>
      tpu.vector_store %arg7[%c0_11, %c0_12], %12 {strides = array<i32>} : memref<512x128xf32, #tpu.memory_space<vmem>>, vector<512x128xf32>,
    } else {
    }
    %c0 = arith.constant 0 : index
    %c0_1 = arith.constant 0 : index
    %3 = vector.load %arg7[%c0, %c0_1] : memref<512x128xf32, #tpu.memory_space<vmem>>, vector<512x128xf32>
    %c0_2 = arith.constant 0 : index
    %c0_3 = arith.constant 0 : index
    %4 = vector.load %arg3[%c0_2, %c0_3] : memref<512x36xbf16, #tpu.memory_space<vmem>>, vector<512x36xbf16>
    %c0_4 = arith.constant 0 : index
    %c0_5 = arith.constant 0 : index
    %5 = vector.load %arg4[%c0_4, %c0_5] : memref<36x128xbf16, #tpu.memory_space<vmem>>, vector<36x128xbf16>
    %cst = arith.constant dense<0.000000e+00> : vector<512x128xf32>
    %6 = tpu.matmul %4, %5, %cst {dimension_numbers = #tpu.dot_dimension_numbers<[1], [0], [0], [1], [0, 0, 1, 1], [], []>} : vector<512x36xbf16>, vector<36x128xbf16>, vector<512x128xf32> -> vector<512x128xf32>
    %7 = arith.addf %3, %6 : vector<512x128xf32>
    %c0_6 = arith.constant 0 : index
    %c0_7 = arith.constant 0 : index
    %8 = vector.load %arg7[%c0_6, %c0_7] : memref<512x128xf32, #tpu.memory_space<vmem>>, vector<512x128xf32>
    tpu.vector_store %arg7[%c0_6, %c0_7], %7 {strides = array<i32>} : memref<512x128xf32, #tpu.memory_space<vmem>>, vector<512x128xf32>,
    %c0_i32_8 = arith.constant 0 : i32
    %9 = arith.cmpi eq, %arg2, %c0_i32_8 : i32
    %10 = arith.extui %9 : i1 to i32
    %c0_i32_9 = arith.constant 0 : i32
    %11 = arith.cmpi ne, %10, %c0_i32_9 : i32
    scf.if %11 {
      %c0_10 = arith.constant 0 : index
      %c0_11 = arith.constant 0 : index
      %12 = vector.load %arg7[%c0_10, %c0_11] : memref<512x128xf32, #tpu.memory_space<vmem>>, vector<512x128xf32>
      %c0_12 = arith.constant 0 : index
      %c0_13 = arith.constant 0 : index
      %13 = vector.load %arg5[%c0_12, %c0_13] : memref<1x128xf32, #tpu.memory_space<vmem>>, vector<1x128xf32>
      %14 = vector.broadcast %13 : vector<1x128xf32> to vector<512x128xf32>
      %15 = arith.addf %12, %14 : vector<512x128xf32>
      %cst_14 = arith.constant 2.000000e-01 : f32
      %16 = vector.broadcast %cst_14 : f32 to vector<512x128xf32>
      %17 = arith.mulf %16, %15 : vector<512x128xf32>
      %18 = arith.maximumf %15, %17 : vector<512x128xf32>
      %c0_15 = arith.constant 0 : index
      %c0_16 = arith.constant 0 : index
      %19 = vector.load %arg6[%c0_15, %c0_16] : memref<512x128xf32, #tpu.memory_space<vmem>>, vector<512x128xf32>
      tpu.vector_store %arg6[%c0_15, %c0_16], %18 {strides = array<i32>} : memref<512x128xf32, #tpu.memory_space<vmem>>, vector<512x128xf32>,
    } else {
    }
    return
  }
  func.func @transform_0(%arg0: i32, %arg1: i32, %arg2: i32) -> (i32, i32) {
    %c0_i32 = arith.constant 0 : i32
    return %arg0, %arg2 : i32, i32
  }
  func.func @transform_1(%arg0: i32, %arg1: i32, %arg2: i32) -> (i32, i32) {
    %c0_i32 = arith.constant 0 : i32
    return %arg2, %arg1 : i32, i32
  }
  func.func @transform_2(%arg0: i32, %arg1: i32, %arg2: i32) -> (i32, i32) {
    %c0_i32 = arith.constant 0 : i32
    %c0_i32_0 = arith.constant 0 : i32
    return %c0_i32, %arg1 : i32, i32
  }
  func.func @transform_3(%arg0: i32, %arg1: i32, %arg2: i32) -> (i32, i32) {
    %c0_i32 = arith.constant 0 : i32
    return %arg0, %arg1 : i32, i32
  }
}

</mosaic_0001>

<bundles_post_ra>
// kernel: sn_conv2_with_activation.1
= control target key start
LH: loop header
LB: loop body
LE: loop exit
PB: predicated region body
PF: predicated region fallthrough
CT: control target
= control target key end

     0   :  { %vm488_vm0 = vcmask 1041408   ;;  %vm391_vm1 = vcmask 293888   ;;  %s1750_s1 = inlined_call_operand.vmem [shape: bf16[36,128], index: 1, kind: input, shape index: {}]   ;;  %s1751_s2 = inlined_call_operand.vmem [shape: f32[1,128], index: 2, kind: input, shape index: {}]   ;;  %s1752_s0 = inlined_call_operand.vmem [shape: bf16[512,36], index: 0, kind: input, shape index: {}]   ;;  %s1753_s3 = inlined_call_operand.vmem [shape: f32[512,128], index: 3, kind: output, shape index: {}]  }
   0x1   :  { %v215_v0 = vld [vmem:[%s1750_s1 + $0x10] sm:$0x3]  ;;  %v1321_v4 = vld [vmem:[%s1750_s1 + $0x8] sm:$0xff]  ;;  %v1320_v5 = vld [vmem:[%s1750_s1] sm:$0xff] }
   0x2   :  { %v385_v1 = vunpack.c.l.b16 %v215_v0  ;;  %v1288_v6 = vld [vmem:[%s1752_s0] sm:$0xff]  ;;  %v1289_v10 = vld [vmem:[%s1752_s0 + $0x8] sm:$0xff]  ;;  %v1290_v14 = vld [vmem:[%s1752_s0 + $0x10] sm:$0xff] }
   0x3   :  { %v1296_v7 = vld [vmem:[%s1752_s0 + $0x40] sm:$0xff]  ;;  %v1297_v11 = vld [vmem:[%s1752_s0 + $0x48] sm:$0xff]  ;;  %v1298_v15 = vld [vmem:[%s1752_s0 + $0x50] sm:$0xff] }
   0x4   :  { %v388_v2 = vpack.c.b16 %v385_v1, %v385_v1  ;;  %v1304_v8 = vld [vmem:[%s1752_s0 + $0x80] sm:$0xff]  ;;  %v1305_v12 = vld [vmem:[%s1752_s0 + $0x88] sm:$0xff]  ;;  %v1306_v16 = vld [vmem:[%s1752_s0 + $0x90] sm:$0xff] }
   0x5   :  { %v1312_v9 = vld [vmem:[%s1752_s0 + $0xc0] sm:$0xff]  ;;  %v1313_v13 = vld [vmem:[%s1752_s0 + $0xc8] sm:$0xff]  ;;  %v1314_v17 = vld [vmem:[%s1752_s0 + $0xd0] sm:$0xff] }
   0x6   :  { %v490_v3 = vsel %vm488_vm0, %v388_v2, 0  ;;  %v1291_v18 = vld [vmem:[%s1752_s0 + $0x18] sm:$0xff]  ;;  %v1292_v22 = vld [vmem:[%s1752_s0 + $0x20] sm:$0xff]  ;;  %v1293_v26 = vld [vmem:[%s1752_s0 + $0x28] sm:$0xff] }
   0x7   :  { %497 = vmatpush.bf16.msra.mxu0 %v490_v3  ;;  %1322 = vmatpush.bf16.msra.mxu1 %v490_v3  ;;  %v1299_v19 = vld [vmem:[%s1752_s0 + $0x58] sm:$0xff]  ;;  %v1300_v23 = vld [vmem:[%s1752_s0 + $0x60] sm:$0xff]  ;;  %v1301_v27 = vld [vmem:[%s1752_s0 + $0x68] sm:$0xff] }
   0x8   :  { %1323 = vmatpush.bf16.msra.mxu2 %v490_v3  ;;  %1324 = vmatpush.bf16.msra.mxu3 %v490_v3  ;;  %v1307_v20 = vld [vmem:[%s1752_s0 + $0x98] sm:$0xff]  ;;  %v1308_v24 = vld [vmem:[%s1752_s0 + $0xa0] sm:$0xff]  ;;  %v1309_v28 = vld [vmem:[%s1752_s0 + $0xa8] sm:$0xff] }
   0x9   :  { %v1315_v21 = vld [vmem:[%s1752_s0 + $0xd8] sm:$0xff]  ;;  %v1316_v25 = vld [vmem:[%s1752_s0 + $0xe0] sm:$0xff]  ;;  %v1317_v29 = vld [vmem:[%s1752_s0 + $0xe8] sm:$0xff] }
   0xa   :  { %v1294_v30 = vld [vmem:[%s1752_s0 + $0x30] sm:$0xff]  ;;  %v1295_v34 = vld [vmem:[%s1752_s0 + $0x38] sm:$0xff]  ;;  %v1492_v38 = vld [vmem:[%s1751_s2] ss:$0 sm:$0xff] }
   0xb   :  { %498 = vmatpush.bf16.msra.mxu0 %v1321_v4  ;;  %1325 = vmatpush.bf16.msra.mxu1 %v1321_v4  ;;  %v1302_v31 = vld [vmem:[%s1752_s0 + $0x70] sm:$0xff]  ;;  %v1303_v35 = vld [vmem:[%s1752_s0 + $0x78] sm:$0xff] }
   0xc   :  { %1326 = vmatpush.bf16.msra.mxu2 %v1321_v4  ;;  %1327 = vmatpush.bf16.msra.mxu3 %v1321_v4  ;;  %v1310_v32 = vld [vmem:[%s1752_s0 + $0xb0] sm:$0xff]  ;;  %v1311_v36 = vld [vmem:[%s1752_s0 + $0xb8] sm:$0xff] }
   0xd   :  { %v1318_v33 = vld [vmem:[%s1752_s0 + $0xf0] sm:$0xff]  ;;  %v1319_v37 = vld [vmem:[%s1752_s0 + $0xf8] sm:$0xff] }
   0xf   :  { %499 = vmatpush.bf16.msra.mxu0 %v1320_v5  ;;  %1328 = vmatpush.bf16.msra.mxu1 %v1320_v5 }
  0x10   :  { %1329 = vmatpush.bf16.msra.mxu2 %v1320_v5  ;;  %1330 = vmatpush.bf16.msra.mxu3 %v1320_v5 }
  0x12   :  { %1256 = vmatmul.msk.bf16.vlgmr.msra.gmra.mxu0 %vm391_vm1, %v1288_v6  ;;  %1264 = vmatmul.msk.bf16.vlgmr.msra.gmra.mxu1 %vm391_vm1, %v1296_v7 }
  0x13   :  { %1272 = vmatmul.msk.bf16.vlgmr.msra.gmra.mxu2 %vm391_vm1, %v1304_v8  ;;  %1280 = vmatmul.msk.bf16.vlgmr.msra.gmra.mxu3 %vm391_vm1, %v1312_v9 }
  0x22   :  { %1257 = vmatmul.msk.bf16.gmra.mxu0 %vm391_vm1, %v1289_v10  ;;  %1265 = vmatmul.msk.bf16.gmra.mxu1 %vm391_vm1, %v1297_v11 }
  0x23   :  { %1273 = vmatmul.msk.bf16.gmra.mxu2 %vm391_vm1, %v1305_v12  ;;  %1281 = vmatmul.msk.bf16.gmra.mxu3 %vm391_vm1, %v1313_v13 }
  0x32   :  { %1258 = vmatmul.msk.bf16.gmra.mxu0 %vm391_vm1, %v1290_v14  ;;  %1266 = vmatmul.msk.bf16.gmra.mxu1 %vm391_vm1, %v1298_v15 }
  0x33   :  { %1274 = vmatmul.msk.bf16.gmra.mxu2 %vm391_vm1, %v1306_v16  ;;  %1282 = vmatmul.msk.bf16.gmra.mxu3 %vm391_vm1, %v1314_v17 }
  0x42   :  { %1259 = vmatmul.msk.bf16.gmra.mxu0 %vm391_vm1, %v1291_v18  ;;  %1267 = vmatmul.msk.bf16.gmra.mxu1 %vm391_vm1, %v1299_v19 }
  0x43   :  { %1275 = vmatmul.msk.bf16.gmra.mxu2 %vm391_vm1, %v1307_v20  ;;  %1283 = vmatmul.msk.bf16.gmra.mxu3 %vm391_vm1, %v1315_v21 }
  0x52   :  { %1260 = vmatmul.msk.bf16.gmra.mxu0 %vm391_vm1, %v1292_v22  ;;  %1268 = vmatmul.msk.bf16.gmra.mxu1 %vm391_vm1, %v1300_v23 }
  0x53   :  { %1276 = vmatmul.msk.bf16.gmra.mxu2 %vm391_vm1, %v1308_v24  ;;  %1284 = vmatmul.msk.bf16.gmra.mxu3 %vm391_vm1, %v1316_v25 }
  0x62   :  { %1261 = vmatmul.msk.bf16.gmra.mxu0 %vm391_vm1, %v1293_v26  ;;  %1269 = vmatmul.msk.bf16.gmra.mxu1 %vm391_vm1, %v1301_v27 }
  0x63   :  { %1277 = vmatmul.msk.bf16.gmra.mxu2 %vm391_vm1, %v1309_v28  ;;  %1285 = vmatmul.msk.bf16.gmra.mxu3 %vm391_vm1, %v1317_v29 }
  0x72   :  { %1262 = vmatmul.msk.bf16.gmra.mxu0 %vm391_vm1, %v1294_v30  ;;  %1270 = vmatmul.msk.bf16.gmra.mxu1 %vm391_vm1, %v1302_v31 }
  0x73   :  { %1278 = vmatmul.msk.bf16.gmra.mxu2 %vm391_vm1, %v1310_v32  ;;  %1286 = vmatmul.msk.bf16.gmra.mxu3 %vm391_vm1, %v1318_v33 }
  0x82   :  { %1263 = vmatmul.msk.bf16.gmra.mxu0 %vm391_vm1, %v1295_v34  ;;  %1271 = vmatmul.msk.bf16.gmra.mxu1 %vm391_vm1, %v1303_v35 }
  0x83   :  { %1279 = vmatmul.msk.bf16.gmra.mxu2 %vm391_vm1, %v1311_v36  ;;  %1287 = vmatmul.msk.bf16.gmra.mxu3 %vm391_vm1, %v1319_v37 }
  0x8f   :  { %v501_v39 = vpop.f32.mrf.mxu0  ;;  %v541_v40 = vpop.f32.mrf.mxu1 }
  0x90   :  { %v860_v41 = vadd.f32 %v1492_v38, %v501_v39  ;;  %v876_v42 = vadd.f32 %v1492_v38, %v541_v40 }
  0x92   :  { %v924_v43 = vmul.f32 0.2, %v860_v41  ;;  %v940_v44 = vmul.f32 0.2, %v876_v42 }
  0x94   :  { %v988_v45 = vmax.f32 %v860_v41, %v924_v43  ;;  %v1004_v46 = vmax.f32 %v876_v42, %v940_v44 }
  0x96   :  { %1052 = vst [vmem:[%s1753_s3] sm:$0xff] %v988_v45  ;;  %v581_v47 = vpop.f32.mrf.mxu2  ;;  %v621_v48 = vpop.f32.mrf.mxu3 }
  0x97   :  { %1068 = vst [vmem:[%s1753_s3 + $0x80] sm:$0xff] %v1004_v46  ;;  %v892_v49 = vadd.f32 %v1492_v38, %v581_v47  ;;  %v908_v50 = vadd.f32 %v1492_v38, %v621_v48  ;;  %v503_v51 = vpop.f32.mrf.mxu0  ;;  %v543_v52 = vpop.f32.mrf.mxu1 }
  0x98   :  { %v861_v53 = vadd.f32 %v1492_v38, %v503_v51  ;;  %v877_v54 = vadd.f32 %v1492_v38, %v543_v52 }
  0x99   :  { %v956_v55 = vmul.f32 0.2, %v892_v49  ;;  %v972_v56 = vmul.f32 0.2, %v908_v50 }
  0x9a   :  { %v925_v57 = vmul.f32 0.2, %v861_v53  ;;  %v941_v58 = vmul.f32 0.2, %v877_v54 }
  0x9b   :  { %v1020_v59 = vmax.f32 %v892_v49, %v956_v55  ;;  %v1036_v60 = vmax.f32 %v908_v50, %v972_v56 }
  0x9c   :  { %v989_v61 = vmax.f32 %v861_v53, %v925_v57  ;;  %v1005_v62 = vmax.f32 %v877_v54, %v941_v58 }
  0x9d   :  { %1084 = vst [vmem:[%s1753_s3 + $0x100] sm:$0xff] %v1020_v59 }
  0x9e   :  { %1100 = vst [vmem:[%s1753_s3 + $0x180] sm:$0xff] %v1036_v60  ;;  %v583_v63 = vpop.f32.mrf.mxu2  ;;  %v623_v0 = vpop.f32.mrf.mxu3 }
  0x9f   :  { %1053 = vst [vmem:[%s1753_s3 + $0x8] sm:$0xff] %v989_v61  ;;  %v893_v1 = vadd.f32 %v1492_v38, %v583_v63  ;;  %v909_v2 = vadd.f32 %v1492_v38, %v623_v0  ;;  %v506_v3 = vpop.f32.mrf.mxu0  ;;  %v546_v4 = vpop.f32.mrf.mxu1 }
  0xa0   :  { %1069 = vst [vmem:[%s1753_s3 + $0x88] sm:$0xff] %v1005_v62  ;;  %v862_v5 = vadd.f32 %v1492_v38, %v506_v3  ;;  %v878_v6 = vadd.f32 %v1492_v38, %v546_v4 }
  0xa1   :  { %v957_v7 = vmul.f32 0.2, %v893_v1  ;;  %v973_v8 = vmul.f32 0.2, %v909_v2 }
  0xa2   :  { %v926_v9 = vmul.f32 0.2, %v862_v5  ;;  %v942_v10 = vmul.f32 0.2, %v878_v6 }
  0xa3   :  { %v1021_v11 = vmax.f32 %v893_v1, %v957_v7  ;;  %v1037_v12 = vmax.f32 %v909_v2, %v973_v8 }
  0xa4   :  { %v990_v13 = vmax.f32 %v862_v5, %v926_v9  ;;  %v1006_v14 = vmax.f32 %v878_v6, %v942_v10 }
  0xa5   :  { %1085 = vst [vmem:[%s1753_s3 + $0x108] sm:$0xff] %v1021_v11 }
  0xa6   :  { %1101 = vst [vmem:[%s1753_s3 + $0x188] sm:$0xff] %v1037_v12  ;;  %v586_v15 = vpop.f32.mrf.mxu2  ;;  %v626_v16 = vpop.f32.mrf.mxu3 }
  0xa7   :  { %1054 = vst [vmem:[%s1753_s3 + $0x10] sm:$0xff] %v990_v13  ;;  %v894_v17 = vadd.f32 %v1492_v38, %v586_v15  ;;  %v910_v18 = vadd.f32 %v1492_v38, %v626_v16  ;;  %v508_v19 = vpop.f32.mrf.mxu0  ;;  %v548_v20 = vpop.f32.mrf.mxu1 }
  0xa8   :  { %1070 = vst [vmem:[%s1753_s3 + $0x90] sm:$0xff] %v1006_v14  ;;  %v863_v21 = vadd.f32 %v1492_v38, %v508_v19  ;;  %v879_v22 = vadd.f32 %v1492_v38, %v548_v20 }
  0xa9   :  { %v958_v23 = vmul.f32 0.2, %v894_v17  ;;  %v974_v24 = vmul.f32 0.2, %v910_v18 }
  0xaa   :  { %v927_v25 = vmul.f32 0.2, %v863_v21  ;;  %v943_v26 = vmul.f32 0.2, %v879_v22 }
  0xab   :  { %v1022_v27 = vmax.f32 %v894_v17, %v958_v23  ;;  %v1038_v28 = vmax.f32 %v910_v18, %v974_v24 }
  0xac   :  { %v991_v29 = vmax.f32 %v863_v21, %v927_v25  ;;  %v1007_v30 = vmax.f32 %v879_v22, %v943_v26 }
  0xad   :  { %1086 = vst [vmem:[%s1753_s3 + $0x110] sm:$0xff] %v1022_v27 }
  0xae   :  { %1102 = vst [vmem:[%s1753_s3 + $0x190] sm:$0xff] %v1038_v28  ;;  %v588_v31 = vpop.f32.mrf.mxu2  ;;  %v628_v32 = vpop.f32.mrf.mxu3 }
  0xaf   :  { %1055 = vst [vmem:[%s1753_s3 + $0x18] sm:$0xff] %v991_v29  ;;  %v895_v33 = vadd.f32 %v1492_v38, %v588_v31  ;;  %v911_v34 = vadd.f32 %v1492_v38, %v628_v32  ;;  %v511_v35 = vpop.f32.mrf.mxu0  ;;  %v551_v36 = vpop.f32.mrf.mxu1 }
  0xb0   :  { %1071 = vst [vmem:[%s1753_s3 + $0x98] sm:$0xff] %v1007_v30  ;;  %v864_v37 = vadd.f32 %v1492_v38, %v511_v35  ;;  %v880_v39 = vadd.f32 %v1492_v38, %v551_v36 }
  0xb1   :  { %v959_v40 = vmul.f32 0.2, %v895_v33  ;;  %v975_v41 = vmul.f32 0.2, %v911_v34 }
  0xb2   :  { %v928_v42 = vmul.f32 0.2, %v864_v37  ;;  %v944_v43 = vmul.f32 0.2, %v880_v39 }
  0xb3   :  { %v1023_v44 = vmax.f32 %v895_v33, %v959_v40  ;;  %v1039_v45 = vmax.f32 %v911_v34, %v975_v41 }
  0xb4   :  { %v992_v46 = vmax.f32 %v864_v37, %v928_v42  ;;  %v1008_v47 = vmax.f32 %v880_v39, %v944_v43 }
  0xb5   :  { %1087 = vst [vmem:[%s1753_s3 + $0x118] sm:$0xff] %v1023_v44 }
  0xb6   :  { %1103 = vst [vmem:[%s1753_s3 + $0x198] sm:$0xff] %v1039_v45  ;;  %v591_v48 = vpop.f32.mrf.mxu2  ;;  %v631_v49 = vpop.f32.mrf.mxu3 }
  0xb7   :  { %1056 = vst [vmem:[%s1753_s3 + $0x20] sm:$0xff] %v992_v46  ;;  %v896_v50 = vadd.f32 %v1492_v38, %v591_v48  ;;  %v912_v51 = vadd.f32 %v1492_v38, %v631_v49  ;;  %v513_v52 = vpop.f32.mrf.mxu0  ;;  %v553_v53 = vpop.f32.mrf.mxu1 }
  0xb8   :  { %1072 = vst [vmem:[%s1753_s3 + $0xa0] sm:$0xff] %v1008_v47  ;;  %v865_v54 = vadd.f32 %v1492_v38, %v513_v52  ;;  %v881_v55 = vadd.f32 %v1492_v38, %v553_v53 }
  0xb9   :  { %v960_v56 = vmul.f32 0.2, %v896_v50  ;;  %v976_v57 = vmul.f32 0.2, %v912_v51 }
  0xba   :  { %v929_v58 = vmul.f32 0.2, %v865_v54  ;;  %v945_v59 = vmul.f32 0.2, %v881_v55 }
  0xbb   :  { %v1024_v60 = vmax.f32 %v896_v50, %v960_v56  ;;  %v1040_v61 = vmax.f32 %v912_v51, %v976_v57 }
  0xbc   :  { %v993_v62 = vmax.f32 %v865_v54, %v929_v58  ;;  %v1009_v63 = vmax.f32 %v881_v55, %v945_v59 }
  0xbd   :  { %1088 = vst [vmem:[%s1753_s3 + $0x120] sm:$0xff] %v1024_v60 }
  0xbe   :  { %1104 = vst [vmem:[%s1753_s3 + $0x1a0] sm:$0xff] %v1040_v61  ;;  %v593_v0 = vpop.f32.mrf.mxu2  ;;  %v633_v1 = vpop.f32.mrf.mxu3 }
  0xbf   :  { %1057 = vst [vmem:[%s1753_s3 + $0x28] sm:$0xff] %v993_v62  ;;  %v897_v2 = vadd.f32 %v1492_v38, %v593_v0  ;;  %v913_v3 = vadd.f32 %v1492_v38, %v633_v1  ;;  %v516_v4 = vpop.f32.mrf.mxu0  ;;  %v556_v5 = vpop.f32.mrf.mxu1 }
  0xc0   :  { %1073 = vst [vmem:[%s1753_s3 + $0xa8] sm:$0xff] %v1009_v63  ;;  %v866_v6 = vadd.f32 %v1492_v38, %v516_v4  ;;  %v882_v7 = vadd.f32 %v1492_v38, %v556_v5 }
  0xc1   :  { %v961_v8 = vmul.f32 0.2, %v897_v2  ;;  %v977_v9 = vmul.f32 0.2, %v913_v3 }
  0xc2   :  { %v930_v10 = vmul.f32 0.2, %v866_v6  ;;  %v946_v11 = vmul.f32 0.2, %v882_v7 }
  0xc3   :  { %v1025_v12 = vmax.f32 %v897_v2, %v961_v8  ;;  %v1041_v13 = vmax.f32 %v913_v3, %v977_v9 }
  0xc4   :  { %v994_v14 = vmax.f32 %v866_v6, %v930_v10  ;;  %v1010_v15 = vmax.f32 %v882_v7, %v946_v11 }
  0xc5   :  { %1089 = vst [vmem:[%s1753_s3 + $0x128] sm:$0xff] %v1025_v12 }
  0xc6   :  { %1105 = vst [vmem:[%s1753_s3 + $0x1a8] sm:$0xff] %v1041_v13  ;;  %v596_v16 = vpop.f32.mrf.mxu2  ;;  %v636_v17 = vpop.f32.mrf.mxu3 }
  0xc7   :  { %1058 = vst [vmem:[%s1753_s3 + $0x30] sm:$0xff] %v994_v14  ;;  %v898_v18 = vadd.f32 %v1492_v38, %v596_v16  ;;  %v914_v19 = vadd.f32 %v1492_v38, %v636_v17  ;;  %v518_v20 = vpop.f32.mrf.mxu0  ;;  %v558_v21 = vpop.f32.mrf.mxu1 }
  0xc8   :  { %1074 = vst [vmem:[%s1753_s3 + $0xb0] sm:$0xff] %v1010_v15  ;;  %v867_v22 = vadd.f32 %v1492_v38, %v518_v20  ;;  %v883_v23 = vadd.f32 %v1492_v38, %v558_v21 }
  0xc9   :  { %v962_v24 = vmul.f32 0.2, %v898_v18  ;;  %v978_v25 = vmul.f32 0.2, %v914_v19 }
  0xca   :  { %v931_v26 = vmul.f32 0.2, %v867_v22  ;;  %v947_v27 = vmul.f32 0.2, %v883_v23 }
  0xcb   :  { %v1026_v28 = vmax.f32 %v898_v18, %v962_v24  ;;  %v1042_v29 = vmax.f32 %v914_v19, %v978_v25 }
  0xcc   :  { %v995_v30 = vmax.f32 %v867_v22, %v931_v26  ;;  %v1011_v31 = vmax.f32 %v883_v23, %v947_v27 }
  0xcd   :  { %1090 = vst [vmem:[%s1753_s3 + $0x130] sm:$0xff] %v1026_v28 }
  0xce   :  { %1106 = vst [vmem:[%s1753_s3 + $0x1b0] sm:$0xff] %v1042_v29  ;;  %v598_v32 = vpop.f32.mrf.mxu2  ;;  %v638_v33 = vpop.f32.mrf.mxu3 }
  0xcf   :  { %1059 = vst [vmem:[%s1753_s3 + $0x38] sm:$0xff] %v995_v30  ;;  %v899_v34 = vadd.f32 %v1492_v38, %v598_v32  ;;  %v915_v35 = vadd.f32 %v1492_v38, %v638_v33  ;;  %v521_v36 = vpop.f32.mrf.mxu0  ;;  %v561_v37 = vpop.f32.mrf.mxu1 }
  0xd0   :  { %1075 = vst [vmem:[%s1753_s3 + $0xb8] sm:$0xff] %v1011_v31  ;;  %v868_v39 = vadd.f32 %v1492_v38, %v521_v36  ;;  %v884_v40 = vadd.f32 %v1492_v38, %v561_v37 }
  0xd1   :  { %v963_v41 = vmul.f32 0.2, %v899_v34  ;;  %v979_v42 = vmul.f32 0.2, %v915_v35 }
  0xd2   :  { %v932_v43 = vmul.f32 0.2, %v868_v39  ;;  %v948_v44 = vmul.f32 0.2, %v884_v40 }
  0xd3   :  { %v1027_v45 = vmax.f32 %v899_v34, %v963_v41  ;;  %v1043_v46 = vmax.f32 %v915_v35, %v979_v42 }
  0xd4   :  { %v996_v47 = vmax.f32 %v868_v39, %v932_v43  ;;  %v1012_v48 = vmax.f32 %v884_v40, %v948_v44 }
  0xd5   :  { %1091 = vst [vmem:[%s1753_s3 + $0x138] sm:$0xff] %v1027_v45 }
  0xd6   :  { %1107 = vst [vmem:[%s1753_s3 + $0x1b8] sm:$0xff] %v1043_v46  ;;  %v601_v49 = vpop.f32.mrf.mxu2  ;;  %v641_v50 = vpop.f32.mrf.mxu3 }
  0xd7   :  { %1060 = vst [vmem:[%s1753_s3 + $0x40] sm:$0xff] %v996_v47  ;;  %v900_v51 = vadd.f32 %v1492_v38, %v601_v49  ;;  %v916_v52 = vadd.f32 %v1492_v38, %v641_v50  ;;  %v523_v53 = vpop.f32.mrf.mxu0  ;;  %v563_v54 = vpop.f32.mrf.mxu1 }
  0xd8   :  { %1076 = vst [vmem:[%s1753_s3 + $0xc0] sm:$0xff] %v1012_v48  ;;  %v869_v55 = vadd.f32 %v1492_v38, %v523_v53  ;;  %v885_v56 = vadd.f32 %v1492_v38, %v563_v54 }
  0xd9   :  { %v964_v57 = vmul.f32 0.2, %v900_v51  ;;  %v980_v58 = vmul.f32 0.2, %v916_v52 }
  0xda   :  { %v933_v59 = vmul.f32 0.2, %v869_v55  ;;  %v949_v60 = vmul.f32 0.2, %v885_v56 }
  0xdb   :  { %v1028_v61 = vmax.f32 %v900_v51, %v964_v57  ;;  %v1044_v62 = vmax.f32 %v916_v52, %v980_v58 }
  0xdc   :  { %v997_v63 = vmax.f32 %v869_v55, %v933_v59  ;;  %v1013_v0 = vmax.f32 %v885_v56, %v949_v60 }
  0xdd   :  { %1092 = vst [vmem:[%s1753_s3 + $0x140] sm:$0xff] %v1028_v61 }
  0xde   :  { %1108 = vst [vmem:[%s1753_s3 + $0x1c0] sm:$0xff] %v1044_v62  ;;  %v603_v1 = vpop.f32.mrf.mxu2  ;;  %v643_v2 = vpop.f32.mrf.mxu3 }
  0xdf   :  { %1061 = vst [vmem:[%s1753_s3 + $0x48] sm:$0xff] %v997_v63  ;;  %v901_v3 = vadd.f32 %v1492_v38, %v603_v1  ;;  %v917_v4 = vadd.f32 %v1492_v38, %v643_v2  ;;  %v526_v5 = vpop.f32.mrf.mxu0  ;;  %v566_v6 = vpop.f32.mrf.mxu1 }
  0xe0   :  { %1077 = vst [vmem:[%s1753_s3 + $0xc8] sm:$0xff] %v1013_v0  ;;  %v870_v7 = vadd.f32 %v1492_v38, %v526_v5  ;;  %v886_v8 = vadd.f32 %v1492_v38, %v566_v6 }
  0xe1   :  { %v965_v9 = vmul.f32 0.2, %v901_v3  ;;  %v981_v10 = vmul.f32 0.2, %v917_v4 }
  0xe2   :  { %v934_v11 = vmul.f32 0.2, %v870_v7  ;;  %v950_v12 = vmul.f32 0.2, %v886_v8 }
  0xe3   :  { %v1029_v13 = vmax.f32 %v901_v3, %v965_v9  ;;  %v1045_v14 = vmax.f32 %v917_v4, %v981_v10 }
  0xe4   :  { %v998_v15 = vmax.f32 %v870_v7, %v934_v11  ;;  %v1014_v16 = vmax.f32 %v886_v8, %v950_v12 }
  0xe5   :  { %1093 = vst [vmem:[%s1753_s3 + $0x148] sm:$0xff] %v1029_v13 }
  0xe6   :  { %1109 = vst [vmem:[%s1753_s3 + $0x1c8] sm:$0xff] %v1045_v14  ;;  %v606_v17 = vpop.f32.mrf.mxu2  ;;  %v646_v18 = vpop.f32.mrf.mxu3 }
  0xe7   :  { %1062 = vst [vmem:[%s1753_s3 + $0x50] sm:$0xff] %v998_v15  ;;  %v902_v19 = vadd.f32 %v1492_v38, %v606_v17  ;;  %v918_v20 = vadd.f32 %v1492_v38, %v646_v18  ;;  %v528_v21 = vpop.f32.mrf.mxu0  ;;  %v568_v22 = vpop.f32.mrf.mxu1 }
  0xe8   :  { %1078 = vst [vmem:[%s1753_s3 + $0xd0] sm:$0xff] %v1014_v16  ;;  %v871_v23 = vadd.f32 %v1492_v38, %v528_v21  ;;  %v887_v24 = vadd.f32 %v1492_v38, %v568_v22 }
  0xe9   :  { %v966_v25 = vmul.f32 0.2, %v902_v19  ;;  %v982_v26 = vmul.f32 0.2, %v918_v20 }
  0xea   :  { %v935_v27 = vmul.f32 0.2, %v871_v23  ;;  %v951_v28 = vmul.f32 0.2, %v887_v24 }
  0xeb   :  { %v1030_v29 = vmax.f32 %v902_v19, %v966_v25  ;;  %v1046_v30 = vmax.f32 %v918_v20, %v982_v26 }
  0xec   :  { %v999_v31 = vmax.f32 %v871_v23, %v935_v27  ;;  %v1015_v32 = vmax.f32 %v887_v24, %v951_v28 }
  0xed   :  { %1094 = vst [vmem:[%s1753_s3 + $0x150] sm:$0xff] %v1030_v29 }
  0xee   :  { %1110 = vst [vmem:[%s1753_s3 + $0x1d0] sm:$0xff] %v1046_v30  ;;  %v608_v33 = vpop.f32.mrf.mxu2  ;;  %v648_v34 = vpop.f32.mrf.mxu3 }
  0xef   :  { %1063 = vst [vmem:[%s1753_s3 + $0x58] sm:$0xff] %v999_v31  ;;  %v903_v35 = vadd.f32 %v1492_v38, %v608_v33  ;;  %v919_v36 = vadd.f32 %v1492_v38, %v648_v34  ;;  %v531_v37 = vpop.f32.mrf.mxu0  ;;  %v571_v39 = vpop.f32.mrf.mxu1 }
  0xf0   :  { %1079 = vst [vmem:[%s1753_s3 + $0xd8] sm:$0xff] %v1015_v32  ;;  %v872_v40 = vadd.f32 %v1492_v38, %v531_v37  ;;  %v888_v41 = vadd.f32 %v1492_v38, %v571_v39 }
  0xf1   :  { %v967_v42 = vmul.f32 0.2, %v903_v35  ;;  %v983_v43 = vmul.f32 0.2, %v919_v36 }
  0xf2   :  { %v936_v44 = vmul.f32 0.2, %v872_v40  ;;  %v952_v45 = vmul.f32 0.2, %v888_v41 }
  0xf3   :  { %v1031_v46 = vmax.f32 %v903_v35, %v967_v42  ;;  %v1047_v47 = vmax.f32 %v919_v36, %v983_v43 }
  0xf4   :  { %v1000_v48 = vmax.f32 %v872_v40, %v936_v44  ;;  %v1016_v49 = vmax.f32 %v888_v41, %v952_v45 }
  0xf5   :  { %1095 = vst [vmem:[%s1753_s3 + $0x158] sm:$0xff] %v1031_v46 }
  0xf6   :  { %1111 = vst [vmem:[%s1753_s3 + $0x1d8] sm:$0xff] %v1047_v47  ;;  %v611_v50 = vpop.f32.mrf.mxu2  ;;  %v651_v51 = vpop.f32.mrf.mxu3 }
  0xf7   :  { %1064 = vst [vmem:[%s1753_s3 + $0x60] sm:$0xff] %v1000_v48  ;;  %v904_v52 = vadd.f32 %v1492_v38, %v611_v50  ;;  %v920_v53 = vadd.f32 %v1492_v38, %v651_v51  ;;  %v533_v54 = vpop.f32.mrf.mxu0  ;;  %v573_v55 = vpop.f32.mrf.mxu1 }
  0xf8   :  { %1080 = vst [vmem:[%s1753_s3 + $0xe0] sm:$0xff] %v1016_v49  ;;  %v873_v56 = vadd.f32 %v1492_v38, %v533_v54  ;;  %v889_v57 = vadd.f32 %v1492_v38, %v573_v55 }
  0xf9   :  { %v968_v58 = vmul.f32 0.2, %v904_v52  ;;  %v984_v59 = vmul.f32 0.2, %v920_v53 }
  0xfa   :  { %v937_v60 = vmul.f32 0.2, %v873_v56  ;;  %v953_v61 = vmul.f32 0.2, %v889_v57 }
  0xfb   :  { %v1032_v62 = vmax.f32 %v904_v52, %v968_v58  ;;  %v1048_v63 = vmax.f32 %v920_v53, %v984_v59 }
  0xfc   :  { %v1001_v0 = vmax.f32 %v873_v56, %v937_v60  ;;  %v1017_v1 = vmax.f32 %v889_v57, %v953_v61 }
  0xfd   :  { %1096 = vst [vmem:[%s1753_s3 + $0x160] sm:$0xff] %v1032_v62 }
  0xfe   :  { %1112 = vst [vmem:[%s1753_s3 + $0x1e0] sm:$0xff] %v1048_v63  ;;  %v613_v2 = vpop.f32.mrf.mxu2  ;;  %v653_v3 = vpop.f32.mrf.mxu3 }
  0xff   :  { %1065 = vst [vmem:[%s1753_s3 + $0x68] sm:$0xff] %v1001_v0  ;;  %v905_v4 = vadd.f32 %v1492_v38, %v613_v2  ;;  %v921_v5 = vadd.f32 %v1492_v38, %v653_v3  ;;  %v536_v6 = vpop.f32.mrf.mxu0  ;;  %v576_v7 = vpop.f32.mrf.mxu1 }
 0x100   :  { %1081 = vst [vmem:[%s1753_s3 + $0xe8] sm:$0xff] %v1017_v1  ;;  %v874_v8 = vadd.f32 %v1492_v38, %v536_v6  ;;  %v890_v9 = vadd.f32 %v1492_v38, %v576_v7 }
 0x101   :  { %v969_v10 = vmul.f32 0.2, %v905_v4  ;;  %v985_v11 = vmul.f32 0.2, %v921_v5 }
 0x102   :  { %v938_v12 = vmul.f32 0.2, %v874_v8  ;;  %v954_v13 = vmul.f32 0.2, %v890_v9 }
 0x103   :  { %v1033_v14 = vmax.f32 %v905_v4, %v969_v10  ;;  %v1049_v15 = vmax.f32 %v921_v5, %v985_v11 }
 0x104   :  { %v1002_v16 = vmax.f32 %v874_v8, %v938_v12  ;;  %v1018_v17 = vmax.f32 %v890_v9, %v954_v13 }
 0x105   :  { %1097 = vst [vmem:[%s1753_s3 + $0x168] sm:$0xff] %v1033_v14 }
 0x106   :  { %1113 = vst [vmem:[%s1753_s3 + $0x1e8] sm:$0xff] %v1049_v15  ;;  %v616_v18 = vpop.f32.mrf.mxu2  ;;  %v656_v19 = vpop.f32.mrf.mxu3 }
 0x107   :  { %1066 = vst [vmem:[%s1753_s3 + $0x70] sm:$0xff] %v1002_v16  ;;  %v906_v20 = vadd.f32 %v1492_v38, %v616_v18  ;;  %v922_v21 = vadd.f32 %v1492_v38, %v656_v19  ;;  %v538_v22 = vpop.f32.mrf.mxu0  ;;  %v578_v23 = vpop.f32.mrf.mxu1 }
 0x108   :  { %1082 = vst [vmem:[%s1753_s3 + $0xf0] sm:$0xff] %v1018_v17  ;;  %v875_v24 = vadd.f32 %v1492_v38, %v538_v22  ;;  %v891_v25 = vadd.f32 %v1492_v38, %v578_v23 }
 0x109   :  { %v970_v26 = vmul.f32 0.2, %v906_v20  ;;  %v986_v27 = vmul.f32 0.2, %v922_v21 }
 0x10a   :  { %v939_v28 = vmul.f32 0.2, %v875_v24  ;;  %v955_v29 = vmul.f32 0.2, %v891_v25 }
 0x10b   :  { %v1034_v30 = vmax.f32 %v906_v20, %v970_v26  ;;  %v1050_v31 = vmax.f32 %v922_v21, %v986_v27 }
 0x10c   :  { %v1003_v32 = vmax.f32 %v875_v24, %v939_v28  ;;  %v1019_v33 = vmax.f32 %v891_v25, %v955_v29 }
 0x10d   :  { %1098 = vst [vmem:[%s1753_s3 + $0x170] sm:$0xff] %v1034_v30 }
 0x10e   :  { %1114 = vst [vmem:[%s1753_s3 + $0x1f0] sm:$0xff] %v1050_v31  ;;  %v618_v34 = vpop.f32.mrf.mxu2  ;;  %v658_v35 = vpop.f32.mrf.mxu3 }
 0x10f   :  { %1067 = vst [vmem:[%s1753_s3 + $0x78] sm:$0xff] %v1003_v32  ;;  %v907_v36 = vadd.f32 %v1492_v38, %v618_v34  ;;  %v923_v37 = vadd.f32 %v1492_v38, %v658_v35 }
 0x110   :  { %1083 = vst [vmem:[%s1753_s3 + $0xf8] sm:$0xff] %v1019_v33 }
 0x111   :  { %v971_v39 = vmul.f32 0.2, %v907_v36  ;;  %v987_v40 = vmul.f32 0.2, %v923_v37 }
 0x113   :  { %v1035_v41 = vmax.f32 %v907_v36, %v971_v39  ;;  %v1051_v42 = vmax.f32 %v923_v37, %v987_v40 }
 0x115   :  { %1099 = vst [vmem:[%s1753_s3 + $0x178] sm:$0xff] %v1035_v41 }
 0x116   :  { %1115 = vst [vmem:[%s1753_s3 + $0x1f8] sm:$0xff] %v1051_v42 }

</bundles_post_ra>
